<compile_context>
chip_gen: v7x
topology: tpu7x:2x2x1
jax: 0.10.0
libtpu: 0.0.40
codegen_flags: <defaults>
</compile_context>

<pallas_src>
import functools
import math

import jax
import jax.numpy as jnp
from jax.experimental import pallas as pl
from jax.experimental.pallas import tpu as pltpu


# ---------------------------------------------------------------------------
# Helpers
# ---------------------------------------------------------------------------
def _layer_norm(x, gamma, beta, eps):
    mean = jnp.mean(x, axis=-1, keepdims=True)
    var = jnp.mean((x - mean) ** 2, axis=-1, keepdims=True)
    return (x - mean) * jax.lax.rsqrt(var + eps) * gamma + beta


def _gelu_erf(x):
    # Matches FeedForward.gelu: x * 0.5 * (1 + erf(x / sqrt(2)))
    return x * 0.5 * (1.0 + jax.lax.erf(x / math.sqrt(2.0)))


def _pick_row_tile(n, target):
    """Largest multiple of 8 that divides n and is <= target (else n)."""
    for cand in range(min(target, n), 7, -1):
        if n % cand == 0 and cand % 8 == 0:
            return cand
    return n


def _pick_lane_chunk(n, target):
    """Largest multiple of 128 that divides n and is <= target (else n)."""
    for cand in range(min(target, n), 127, -1):
        if n % cand == 0 and cand % 128 == 0:
            return cand
    return n


def _device_tuning():
    """Return (vmem_limit_bytes or None, default query tile) per chip."""
    try:
        kind = jax.devices()[0].device_kind.lower()
    except Exception:  # pragma: no cover
        kind = ""
    if "v7" in kind:                       # 64 MiB physical VMEM per TensorCore
        return 48 * 1024 * 1024, 256
    if "v5" in kind or "v6" in kind:       # 128 MiB physical VMEM
        return 100 * 1024 * 1024, 512
    return None, 256                       # unknown chip: leave compiler default


def _const_spec(shape, single_buffer):
    index_map = lambda *_: (0,) * len(shape)
    if single_buffer:
        # Constant block index -> one VMEM buffer is enough (no prefetch needed).
        return pl.BlockSpec(shape, index_map, pipeline_mode=pl.Buffered(1))
    return pl.BlockSpec(shape, index_map)


# ---------------------------------------------------------------------------
# K/V projection kernel (lane-dense, hoisted out of the attention kernel)
# ---------------------------------------------------------------------------
def _kv_proj_kernel(x_ref, wk_ref, bk_ref, wv_ref, bv_ref, k_ref, v_ref):
    x_bf = x_ref[...].astype(jnp.bfloat16)
    k = jnp.dot(x_bf, wk_ref[...], preferred_element_type=jnp.float32) + bk_ref[...]
    v = jnp.dot(x_bf, wv_ref[...], preferred_element_type=jnp.float32) + bv_ref[...]
    k_ref[...] = k.astype(k_ref.dtype)
    v_ref[...] = v.astype(v_ref.dtype)


def _kv_projection(x, wk, bk, wv, bv, *, row_tile, vmem_limit, single_buffer):
    B, S, H = x.shape
    ts = _pick_row_tile(S, row_tile)
    const = functools.partial(_const_spec, single_buffer=single_buffer)
    return pl.pallas_call(
        _kv_proj_kernel,
        out_shape=(jax.ShapeDtypeStruct((B, S, H), jnp.bfloat16),
                   jax.ShapeDtypeStruct((B, S, H), jnp.bfloat16)),
        grid_spec=pltpu.PrefetchScalarGridSpec(
            num_scalar_prefetch=0,
            grid=(B, S // ts),
            in_specs=[pl.BlockSpec((None, ts, H), lambda b, si: (b, si, 0)),
                      const((H, H)), const((1, H)),
                      const((H, H)), const((1, H))],
            out_specs=[pl.BlockSpec((None, ts, H), lambda b, si: (b, si, 0)),
                       pl.BlockSpec((None, ts, H), lambda b, si: (b, si, 0))]),
        compiler_params=pltpu.CompilerParams(
            dimension_semantics=("parallel", "parallel"),
            vmem_limit_bytes=vmem_limit),
    )(x, wk, bk, wv, bv)


# ---------------------------------------------------------------------------
# Fused attention + feed-forward kernel
# ---------------------------------------------------------------------------
def _attn_ffn_kernel(
    x_ref, mask_ref, kT_ref, v_ref,
    wq_ref, bq_ref, wo_ref, bo_ref, ln1_g_ref, ln1_b_ref,
    w1_ref, b1_ref, w2_ref, b2_ref, ln2_g_ref, ln2_b_ref,
    o_ref,
    q_scr, ctx_scr, *ffn_scratch,
    n_heads, head_dim, eps, ffn_stream, ffn_chunk):
    H = x_ref.shape[-1]
    d = head_dim
    scale = 1.0 / math.sqrt(d)

    x_q = x_ref[...]                                     # (tq, H) f32
    mask = mask_ref[...].astype(jnp.float32)             # (tq, S)

    # ---- Q projection: one lane-dense (tq,H)@(H,H) MXU matmul for all heads.
    q_all = (jnp.dot(x_q.astype(jnp.bfloat16), wq_ref[...],
                     preferred_element_type=jnp.float32) + bq_ref[...]) * scale
    q_scr[...] = q_all.astype(jnp.bfloat16)

    # ---- Per-head attention.  The head_dim-sized contraction (scores) and
    # output width (probs @ V) are inherent to MHA; q / per-head context are
    # staged through VMEM scratch so the unrolled loop carries no big values.
    for h in range(n_heads):
        lo = h * d
        q_h = q_scr[:, lo:lo + d]                        # (tq, d) bf16
        kT_h = kT_ref[lo:lo + d, :]                      # (d, S) bf16, pre-transposed
        scores = jnp.dot(q_h, kT_h, preferred_element_type=jnp.float32) + mask
        scores = scores - jnp.max(scores, axis=-1, keepdims=True)
        p = jnp.exp(scores)
        p = p * (1.0 / jnp.sum(p, axis=-1, keepdims=True))   # exact softmax denom
        # TODO(synk): attention-prob dropout skipped (eval-mode identity).
        ctx_h = jnp.dot(p.astype(jnp.bfloat16), v_ref[:, lo:lo + d],
                        preferred_element_type=jnp.float32)  # (tq, d)
        ctx_scr[:, lo:lo + d] = ctx_h.astype(jnp.bfloat16)

    # ---- Output projection: single (tq,H)@(H,H) matmul over concatenated heads.
    attn = jnp.dot(ctx_scr[...], wo_ref[...], preferred_element_type=jnp.float32)
    attn = _layer_norm(attn + bo_ref[...] + x_q,
                       ln1_g_ref[...], ln1_b_ref[...], eps)   # (tq, H) f32
    attn_bf = attn.astype(jnp.bfloat16)

    # ---- Point-wise feed-forward (erf-GELU) + residual LayerNorm.
    if ffn_stream:
        # FFN weights too large to keep resident: stream I-chunks from HBM and
        # accumulate into an f32 VMEM scratch.
        ffn_acc, = ffn_scratch
        ffn_acc[...] = jnp.zeros_like(ffn_acc)
        n_chunks = w1_ref.shape[-1] // ffn_chunk

        def ffn_step(w1_blk, b1_blk, w2_blk):
            h1 = _gelu_erf(jnp.dot(attn_bf, w1_blk[...],
                                   preferred_element_type=jnp.float32) + b1_blk[...])
            ffn_acc[...] += jnp.dot(h1.astype(jnp.bfloat16), w2_blk[...],
                                    preferred_element_type=jnp.float32)

        pltpu.emit_pipeline(
            ffn_step,
            grid=(n_chunks,),
            in_specs=[pl.BlockSpec((H, ffn_chunk), lambda c: (0, c)),
                      pl.BlockSpec((1, ffn_chunk), lambda c: (0, c)),
                      pl.BlockSpec((ffn_chunk, H), lambda c: (c, 0))],
        )(w1_ref, b1_ref, w2_ref)
        h2 = ffn_acc[...] + b2_ref[...]
    else:
        h1 = _gelu_erf(jnp.dot(attn_bf, w1_ref[...],
                               preferred_element_type=jnp.float32) + b1_ref[...])
        h2 = jnp.dot(h1.astype(jnp.bfloat16), w2_ref[...],
                     preferred_element_type=jnp.float32) + b2_ref[...]

    out = _layer_norm(h2 + attn, ln2_g_ref[...], ln2_b_ref[...], eps)
    o_ref[...] = out.astype(o_ref.dtype)


# ---------------------------------------------------------------------------
# Wrapper
# ---------------------------------------------------------------------------
def transformer_layer(x, attention_mask, params, *, n_heads, eps,
                      q_tile=None, ffn_stream=None, ffn_chunk_target=512,
                      single_buffer_weights=True):
    """x: (B, S, H) f32; attention_mask: (B,1,S,S) or (1,1,S,S) additive mask."""
    B, S, H = x.shape
    assert H % n_heads == 0
    d = H // n_heads
    I = params["w1"].shape[1]
    bf16 = jnp.bfloat16

    vmem_limit, default_q_tile = _device_tuning()
    tq = _pick_row_tile(S, q_tile if q_tile is not None else default_q_tile)
    num_q = S // tq

    # Keep FFN weights resident when they fit comfortably; stream from HBM otherwise.
    if ffn_stream is None:
        ffn_stream = (2 * H * I * 2) > 24 * 1024 * 1024      # bf16 w1 + w2 bytes
    ffn_chunk = _pick_lane_chunk(I, ffn_chunk_target) if ffn_stream else I

    wq = params["wq"].astype(bf16)
    wk = params["wk"].astype(bf16)
    wv = params["wv"].astype(bf16)
    wo = params["wo"].astype(bf16)
    w1 = params["w1"].astype(bf16)
    w2 = params["w2"].astype(bf16)
    # bf16 additive mask: mask logits only need to dominate/underflow the softmax,
    # so bf16 precision is ample and the O(S^2) HBM stream is halved.
    mask_bf = attention_mask.astype(bf16)

    if attention_mask.shape[0] == 1:
        mask_map = lambda b, qi: (0, 0, qi, 0)
    else:
        mask_map = lambda b, qi: (b, 0, qi, 0)

    def run(single_buffer, stream):
        # K/V projections (lane-dense), hoisted out of the attention kernel.
        k, v = _kv_projection(x, wk, params["bk"], wv, params["bv"],
                              row_tile=max(tq, 256), vmem_limit=vmem_limit,
                              single_buffer=single_buffer)
        kT = jnp.swapaxes(k, 1, 2)                           # (B, H, S) bf16

        const = functools.partial(_const_spec, single_buffer=single_buffer)
        if stream:
            w1_spec = pl.BlockSpec(memory_space=pl.ANY)
            b1_spec = pl.BlockSpec(memory_space=pl.ANY)
            w2_spec = pl.BlockSpec(memory_space=pl.ANY)
        else:
            w1_spec, b1_spec, w2_spec = const((H, I)), const((1, I)), const((I, H))

        in_specs = [
            pl.BlockSpec((None, tq, H), lambda b, qi: (b, qi, 0)),   # x query tile
            pl.BlockSpec((None, None, tq, S), mask_map),             # additive mask (bf16)
            pl.BlockSpec((None, H, S), lambda b, qi: (b, 0, 0)),     # K^T, resident per batch row
            pl.BlockSpec((None, S, H), lambda b, qi: (b, 0, 0)),     # V,   resident per batch row
            const((H, H)), const((1, H)),                            # wq, bq
            const((H, H)), const((1, H)),                            # wo, bo
            const((1, H)), const((1, H)),                            # ln1 gamma, beta
            w1_spec, b1_spec, w2_spec, const((1, H)),                # w1, b1, w2, b2
            const((1, H)), const((1, H)),                            # ln2 gamma, beta
        ]
        scratch = [pltpu.VMEM((tq, H), bf16),                        # Q (all heads)
                   pltpu.VMEM((tq, H), bf16)]                        # per-head context
        if stream:
            scratch.append(pltpu.VMEM((tq, H), jnp.float32))         # FFN accumulator

        kernel = functools.partial(
            _attn_ffn_kernel, n_heads=n_heads, head_dim=d, eps=eps,
            ffn_stream=stream, ffn_chunk=ffn_chunk)

        return pl.pallas_call(
            kernel,
            out_shape=jax.ShapeDtypeStruct((B, S, H), x.dtype),
            grid_spec=pltpu.PrefetchScalarGridSpec(
                num_scalar_prefetch=0,
                grid=(B, num_q),
                in_specs=in_specs,
                out_specs=pl.BlockSpec((None, tq, H), lambda b, qi: (b, qi, 0)),
                scratch_shapes=scratch),
            compiler_params=pltpu.CompilerParams(
                dimension_semantics=("parallel", "parallel"),
                vmem_limit_bytes=vmem_limit),
        )(
            x, mask_bf, kT, v,
            wq, params["bq"], wo, params["bo"], params["ln1_g"], params["ln1_b"],
            w1, params["b1"], w2, params["b2"], params["ln2_g"], params["ln2_b"],
        )

    # Try the most aggressive configuration first; gracefully fall back if
    # single-buffered weights or the streamed-FFN path are not supported.
    configs = []
    for sb in ((True, False) if single_buffer_weights else (False,)):
        for st in ((True, False) if ffn_stream else (False,)):
            if (sb, st) not in configs:
                configs.append((sb, st))
    last_err = None
    for sb, st in configs:
        try:
            return jax.block_until_ready(run(sb, st))
        except Exception as err:  # version/VMEM-dependent fallback
            last_err = err
    raise last_err


# ---------------------------------------------------------------------------
# Pure-JAX reference mirroring the PyTorch forward (eval mode, f32)
# ---------------------------------------------------------------------------
def reference_transformer_layer(x, attention_mask, params, *, n_heads, eps):
    B, S, H = x.shape
    d = H // n_heads

    def lin(a, w, b):
        return a @ w + b

    q = lin(x, params["wq"], params["bq"][0])
    k = lin(x, params["wk"], params["bk"][0])
    v = lin(x, params["wv"], params["bv"][0])

    def split(a):  # (B,S,H) -> (B,heads,S,d)
        return a.reshape(B, S, n_heads, d).transpose(0, 2, 1, 3)

    qh, kh, vh = split(q), split(k), split(v)
    scores = jnp.einsum("bhqd,bhkd->bhqk", qh, kh) / math.sqrt(d)
    scores = scores + attention_mask
    probs = jax.nn.softmax(scores, axis=-1)
    ctx = jnp.einsum("bhqk,bhkd->bhqd", probs, vh)
    ctx = ctx.transpose(0, 2, 1, 3).reshape(B, S, H)
    attn = lin(ctx, params["wo"], params["bo"][0])

    def ln(a, g, b):
        mu = a.mean(-1, keepdims=True)
        var = ((a - mu) ** 2).mean(-1, keepdims=True)
        return (a - mu) / jnp.sqrt(var + eps) * g[0] + b[0]

    attn = ln(attn + x, params["ln1_g"], params["ln1_b"])
    h1 = lin(attn, params["w1"], params["b1"][0])
    h1 = h1 * 0.5 * (1.0 + jax.lax.erf(h1 / math.sqrt(2.0)))
    h2 = lin(h1, params["w2"], params["b2"][0])
    return ln(h2 + attn, params["ln2_g"], params["ln2_b"])


def init_params(key, hidden_size, intermediate_size):
    keys = jax.random.split(key, 8)
    H, I = hidden_size, intermediate_size
    s = 0.02
    return {
        "wq": jax.random.normal(keys[0], (H, H), jnp.float32) * s,
        "bq": jnp.zeros((1, H), jnp.float32),
        "wk": jax.random.normal(keys[1], (H, H), jnp.float32) * s,
        "bk": jnp.zeros((1, H), jnp.float32),
        "wv": jax.random.normal(keys[2], (H, H), jnp.float32) * s,
        "bv": jnp.zeros((1, H), jnp.float32),
        "wo": jax.random.normal(keys[3], (H, H), jnp.float32) * s,
        "bo": jnp.zeros((1, H), jnp.float32),
        "ln1_g": jnp.ones((1, H), jnp.float32),
        "ln1_b": jnp.zeros((1, H), jnp.float32),
        "w1": jax.random.normal(keys[4], (H, I), jnp.float32) * s,
        "b1": jnp.zeros((1, I), jnp.float32),
        "w2": jax.random.normal(keys[5], (I, H), jnp.float32) * s,
        "b2": jnp.zeros((1, H), jnp.float32),
        "ln2_g": jnp.ones((1, H), jnp.float32),
        "ln2_b": jnp.zeros((1, H), jnp.float32),
    }


if __name__ == "__main__":
    B, S, H, I, n_heads = 2, 8, 32, 64, 2
    eps = 1e-12

    root = jax.random.PRNGKey(0)
    k_x, k_p, k_p2 = jax.random.split(root, 3)
    x = jax.random.normal(k_x, (B, S, H), jnp.float32)

    # Additive attention mask (0 = keep, -10000 = masked), broadcast over batch.
    key_pos = jnp.arange(S)
    valid = (key_pos < S - 1).astype(jnp.float32)          # mask out last key position
    attention_mask = ((1.0 - valid) * -10000.0)[None, None, None, :]
    attention_mask = jnp.broadcast_to(attention_mask, (1, 1, S, S)).astype(jnp.float32)

    params = init_params(k_p, H, I)
    out = transformer_layer(x, attention_mask, params, n_heads=n_heads, eps=eps)
    out = jax.block_until_ready(out)
    ref = reference_transformer_layer(x, attention_mask, params, n_heads=n_heads, eps=eps)
    assert out.shape == (B, S, H)
    # bf16 matmul operands (f32 accumulation) -> looser tolerance vs f32 reference.
    assert jnp.allclose(out, ref, atol=2e-2, rtol=2e-2), "mismatch vs JAX reference"

    # Also exercise the HBM-streamed FFN path (auto-selected for large H*I) on a
    # larger intermediate size so the emit_pipeline route is validated too.
    I2 = 256
    params2 = init_params(k_p2, H, I2)
    out2 = transformer_layer(x, attention_mask, params2, n_heads=n_heads, eps=eps,
                             ffn_stream=True, ffn_chunk_target=128)
    out2 = jax.block_until_ready(out2)
    ref2 = reference_transformer_layer(x, attention_mask, params2, n_heads=n_heads, eps=eps)
    assert jnp.allclose(out2, ref2, atol=2e-2, rtol=2e-2), \
        "mismatch vs JAX reference (streamed FFN)"

    print("KERNEL_OK")
</pallas_src>

<mosaic_0001>
module attributes {stable_mosaic.version = 11 : i64} {
  func.func @_kv_proj_kernel(%arg0: i32, %arg1: i32, %arg2: memref<1x8x32xf32, #tpu.memory_space<vmem>>, %arg3: memref<32x32xbf16, #tpu.memory_space<vmem>>, %arg4: memref<1x32xf32, #tpu.memory_space<vmem>>, %arg5: memref<32x32xbf16, #tpu.memory_space<vmem>>, %arg6: memref<1x32xf32, #tpu.memory_space<vmem>>, %arg7: memref<1x8x32xbf16, #tpu.memory_space<vmem>>, %arg8: memref<1x8x32xbf16, #tpu.memory_space<vmem>>) attributes {dimension_semantics = [#tpu.dimension_semantics<parallel>, #tpu.dimension_semantics<parallel>], iteration_bounds = array<i64: 2, 1>, scalar_prefetch = 0 : i64, scratch_operands = 0 : i64, tpu.core_type = #tpu.core_type<tc>, window_params = [{transform_indices = @transform_0, window_bounds = array<i64: 1, 8, 32>}, {pipeline_mode = #tpu.pipeline_mode<synchronous>, transform_indices = @transform_1, window_bounds = array<i64: 32, 32>}, {pipeline_mode = #tpu.pipeline_mode<synchronous>, transform_indices = @transform_2, window_bounds = array<i64: 1, 32>}, {pipeline_mode = #tpu.pipeline_mode<synchronous>, transform_indices = @transform_3, window_bounds = array<i64: 32, 32>}, {pipeline_mode = #tpu.pipeline_mode<synchronous>, transform_indices = @transform_4, window_bounds = array<i64: 1, 32>}, {transform_indices = @transform_5, window_bounds = array<i64: 1, 8, 32>}, {transform_indices = @transform_6, window_bounds = array<i64: 1, 8, 32>}]} {
    %c0 = arith.constant 0 : index
    %c0_0 = arith.constant 0 : index
    %c0_1 = arith.constant 0 : index
    %0 = vector.load %arg2[%c0, %c0_0, %c0_1] : memref<1x8x32xf32, #tpu.memory_space<vmem>>, vector<1x8x32xf32>
    %1 = vector.shape_cast %0 : vector<1x8x32xf32> to vector<8x32xf32>
    %2 = arith.truncf %1 : vector<8x32xf32> to vector<8x32xbf16>
    %c0_2 = arith.constant 0 : index
    %c0_3 = arith.constant 0 : index
    %3 = vector.load %arg3[%c0_2, %c0_3] : memref<32x32xbf16, #tpu.memory_space<vmem>>, vector<32x32xbf16>
    %cst = arith.constant dense<0.000000e+00> : vector<8x32xf32>
    %4 = tpu.matmul %2, %3, %cst {dimension_numbers = #tpu.dot_dimension_numbers<[1], [0], [0], [1], [0, 0, 1, 1], [], []>} : vector<8x32xbf16>, vector<32x32xbf16>, vector<8x32xf32> -> vector<8x32xf32>
    %c0_4 = arith.constant 0 : index
    %c0_5 = arith.constant 0 : index
    %5 = vector.load %arg4[%c0_4, %c0_5] : memref<1x32xf32, #tpu.memory_space<vmem>>, vector<1x32xf32>
    %6 = vector.broadcast %5 : vector<1x32xf32> to vector<8x32xf32>
    %7 = arith.addf %4, %6 : vector<8x32xf32>
    %c0_6 = arith.constant 0 : index
    %c0_7 = arith.constant 0 : index
    %8 = vector.load %arg5[%c0_6, %c0_7] : memref<32x32xbf16, #tpu.memory_space<vmem>>, vector<32x32xbf16>
    %cst_8 = arith.constant dense<0.000000e+00> : vector<8x32xf32>
    %9 = tpu.matmul %2, %8, %cst_8 {dimension_numbers = #tpu.dot_dimension_numbers<[1], [0], [0], [1], [0, 0, 1, 1], [], []>} : vector<8x32xbf16>, vector<32x32xbf16>, vector<8x32xf32> -> vector<8x32xf32>
    %c0_9 = arith.constant 0 : index
    %c0_10 = arith.constant 0 : index
    %10 = vector.load %arg6[%c0_9, %c0_10] : memref<1x32xf32, #tpu.memory_space<vmem>>, vector<1x32xf32>
    %11 = vector.broadcast %10 : vector<1x32xf32> to vector<8x32xf32>
    %12 = arith.addf %9, %11 : vector<8x32xf32>
    %13 = arith.truncf %7 : vector<8x32xf32> to vector<8x32xbf16>
    %c0_11 = arith.constant 0 : index
    %c0_12 = arith.constant 0 : index
    %c0_13 = arith.constant 0 : index
    %14 = vector.load %arg7[%c0_11, %c0_12, %c0_13] : memref<1x8x32xbf16, #tpu.memory_space<vmem>>, vector<1x8x32xbf16>
    %15 = vector.shape_cast %14 : vector<1x8x32xbf16> to vector<8x32xbf16>
    %16 = vector.shape_cast %13 : vector<8x32xbf16> to vector<1x8x32xbf16>
    tpu.vector_store %arg7[%c0_11, %c0_12, %c0_13], %16 {strides = array<i32>} : memref<1x8x32xbf16, #tpu.memory_space<vmem>>, vector<1x8x32xbf16>,
    %17 = arith.truncf %12 : vector<8x32xf32> to vector<8x32xbf16>
    %c0_14 = arith.constant 0 : index
    %c0_15 = arith.constant 0 : index
    %c0_16 = arith.constant 0 : index
    %18 = vector.load %arg8[%c0_14, %c0_15, %c0_16] : memref<1x8x32xbf16, #tpu.memory_space<vmem>>, vector<1x8x32xbf16>
    %19 = vector.shape_cast %18 : vector<1x8x32xbf16> to vector<8x32xbf16>
    %20 = vector.shape_cast %17 : vector<8x32xbf16> to vector<1x8x32xbf16>
    tpu.vector_store %arg8[%c0_14, %c0_15, %c0_16], %20 {strides = array<i32>} : memref<1x8x32xbf16, #tpu.memory_space<vmem>>, vector<1x8x32xbf16>,
    return
  }
  func.func @transform_0(%arg0: i32, %arg1: i32) -> (i32, i32, i32) {
    %c0_i32 = arith.constant 0 : i32
    %c0_i32_0 = arith.constant 0 : i32
    return %arg0, %arg1, %c0_i32 : i32, i32, i32
  }
  func.func @transform_1(%arg0: i32, %arg1: i32) -> (i32, i32) {
    %c0_i32 = arith.constant 0 : i32
    %c0_i32_0 = arith.constant 0 : i32
    %c0_i32_1 = arith.constant 0 : i32
    return %c0_i32, %c0_i32_0 : i32, i32
  }
  func.func @transform_2(%arg0: i32, %arg1: i32) -> (i32, i32) {
    %c0_i32 = arith.constant 0 : i32
    %c0_i32_0 = arith.constant 0 : i32
    %c0_i32_1 = arith.constant 0 : i32
    return %c0_i32, %c0_i32_0 : i32, i32
  }
  func.func @transform_3(%arg0: i32, %arg1: i32) -> (i32, i32) {
    %c0_i32 = arith.constant 0 : i32
    %c0_i32_0 = arith.constant 0 : i32
    %c0_i32_1 = arith.constant 0 : i32
    return %c0_i32, %c0_i32_0 : i32, i32
  }
  func.func @transform_4(%arg0: i32, %arg1: i32) -> (i32, i32) {
    %c0_i32 = arith.constant 0 : i32
    %c0_i32_0 = arith.constant 0 : i32
    %c0_i32_1 = arith.constant 0 : i32
    return %c0_i32, %c0_i32_0 : i32, i32
  }
  func.func @transform_5(%arg0: i32, %arg1: i32) -> (i32, i32, i32) {
    %c0_i32 = arith.constant 0 : i32
    %c0_i32_0 = arith.constant 0 : i32
    return %arg0, %arg1, %c0_i32 : i32, i32, i32
  }
  func.func @transform_6(%arg0: i32, %arg1: i32) -> (i32, i32, i32) {
    %c0_i32 = arith.constant 0 : i32
    %c0_i32_0 = arith.constant 0 : i32
    return %arg0, %arg1, %c0_i32 : i32, i32, i32
  }
}

module attributes {stable_mosaic.version = 11 : i64} {
  func.func @_kv_proj_kernel(%arg0: i32, %arg1: i32, %arg2: memref<1x8x32xf32, #tpu.memory_space<vmem>>, %arg3: memref<32x32xbf16, #tpu.memory_space<vmem>>, %arg4: memref<1x32xf32, #tpu.memory_space<vmem>>, %arg5: memref<32x32xbf16, #tpu.memory_space<vmem>>, %arg6: memref<1x32xf32, #tpu.memory_space<vmem>>, %arg7: memref<1x8x32xbf16, #tpu.memory_space<vmem>>, %arg8: memref<1x8x32xbf16, #tpu.memory_space<vmem>>) attributes {dimension_semantics = [#tpu.dimension_semantics<parallel>, #tpu.dimension_semantics<parallel>], iteration_bounds = array<i64: 2, 1>, scalar_prefetch = 0 : i64, scratch_operands = 0 : i64, tpu.core_type = #tpu.core_type<tc>, window_params = [{transform_indices = @transform_0, window_bounds = array<i64: 1, 8, 32>}, {pipeline_mode = #tpu.pipeline_mode<synchronous>, transform_indices = @transform_1, window_bounds = array<i64: 32, 32>}, {pipeline_mode = #tpu.pipeline_mode<synchronous>, transform_indices = @transform_2, window_bounds = array<i64: 1, 32>}, {pipeline_mode = #tpu.pipeline_mode<synchronous>, transform_indices = @transform_3, window_bounds = array<i64: 32, 32>}, {pipeline_mode = #tpu.pipeline_mode<synchronous>, transform_indices = @transform_4, window_bounds = array<i64: 1, 32>}, {transform_indices = @transform_5, window_bounds = array<i64: 1, 8, 32>}, {transform_indices = @transform_6, window_bounds = array<i64: 1, 8, 32>}]} {
    %c0 = arith.constant 0 : index
    %c0_0 = arith.constant 0 : index
    %c0_1 = arith.constant 0 : index
    %0 = vector.load %arg2[%c0, %c0_0, %c0_1] : memref<1x8x32xf32, #tpu.memory_space<vmem>>, vector<1x8x32xf32>
    %1 = vector.shape_cast %0 : vector<1x8x32xf32> to vector<8x32xf32>
    %2 = arith.truncf %1 : vector<8x32xf32> to vector<8x32xbf16>
    %c0_2 = arith.constant 0 : index
    %c0_3 = arith.constant 0 : index
    %3 = vector.load %arg3[%c0_2, %c0_3] : memref<32x32xbf16, #tpu.memory_space<vmem>>, vector<32x32xbf16>
    %cst = arith.constant dense<0.000000e+00> : vector<8x32xf32>
    %4 = tpu.matmul %2, %3, %cst {dimension_numbers = #tpu.dot_dimension_numbers<[1], [0], [0], [1], [0, 0, 1, 1], [], []>} : vector<8x32xbf16>, vector<32x32xbf16>, vector<8x32xf32> -> vector<8x32xf32>
    %c0_4 = arith.constant 0 : index
    %c0_5 = arith.constant 0 : index
    %5 = vector.load %arg4[%c0_4, %c0_5] : memref<1x32xf32, #tpu.memory_space<vmem>>, vector<1x32xf32>
    %6 = vector.broadcast %5 : vector<1x32xf32> to vector<8x32xf32>
    %7 = arith.addf %4, %6 : vector<8x32xf32>
    %c0_6 = arith.constant 0 : index
    %c0_7 = arith.constant 0 : index
    %8 = vector.load %arg5[%c0_6, %c0_7] : memref<32x32xbf16, #tpu.memory_space<vmem>>, vector<32x32xbf16>
    %cst_8 = arith.constant dense<0.000000e+00> : vector<8x32xf32>
    %9 = tpu.matmul %2, %8, %cst_8 {dimension_numbers = #tpu.dot_dimension_numbers<[1], [0], [0], [1], [0, 0, 1, 1], [], []>} : vector<8x32xbf16>, vector<32x32xbf16>, vector<8x32xf32> -> vector<8x32xf32>
    %c0_9 = arith.constant 0 : index
    %c0_10 = arith.constant 0 : index
    %10 = vector.load %arg6[%c0_9, %c0_10] : memref<1x32xf32, #tpu.memory_space<vmem>>, vector<1x32xf32>
    %11 = vector.broadcast %10 : vector<1x32xf32> to vector<8x32xf32>
    %12 = arith.addf %9, %11 : vector<8x32xf32>
    %13 = arith.truncf %7 : vector<8x32xf32> to vector<8x32xbf16>
    %c0_11 = arith.constant 0 : index
    %c0_12 = arith.constant 0 : index
    %c0_13 = arith.constant 0 : index
    %14 = vector.load %arg7[%c0_11, %c0_12, %c0_13] : memref<1x8x32xbf16, #tpu.memory_space<vmem>>, vector<1x8x32xbf16>
    %15 = vector.shape_cast %14 : vector<1x8x32xbf16> to vector<8x32xbf16>
    %16 = vector.shape_cast %13 : vector<8x32xbf16> to vector<1x8x32xbf16>
    tpu.vector_store %arg7[%c0_11, %c0_12, %c0_13], %16 {strides = array<i32>} : memref<1x8x32xbf16, #tpu.memory_space<vmem>>, vector<1x8x32xbf16>,
    %17 = arith.truncf %12 : vector<8x32xf32> to vector<8x32xbf16>
    %c0_14 = arith.constant 0 : index
    %c0_15 = arith.constant 0 : index
    %c0_16 = arith.constant 0 : index
    %18 = vector.load %arg8[%c0_14, %c0_15, %c0_16] : memref<1x8x32xbf16, #tpu.memory_space<vmem>>, vector<1x8x32xbf16>
    %19 = vector.shape_cast %18 : vector<1x8x32xbf16> to vector<8x32xbf16>
    %20 = vector.shape_cast %17 : vector<8x32xbf16> to vector<1x8x32xbf16>
    tpu.vector_store %arg8[%c0_14, %c0_15, %c0_16], %20 {strides = array<i32>} : memref<1x8x32xbf16, #tpu.memory_space<vmem>>, vector<1x8x32xbf16>,
    return
  }
  func.func @transform_0(%arg0: i32, %arg1: i32) -> (i32, i32, i32) {
    %c0_i32 = arith.constant 0 : i32
    %c0_i32_0 = arith.constant 0 : i32
    return %arg0, %arg1, %c0_i32 : i32, i32, i32
  }
  func.func @transform_1(%arg0: i32, %arg1: i32) -> (i32, i32) {
    %c0_i32 = arith.constant 0 : i32
    %c0_i32_0 = arith.constant 0 : i32
    %c0_i32_1 = arith.constant 0 : i32
    return %c0_i32, %c0_i32_0 : i32, i32
  }
  func.func @transform_2(%arg0: i32, %arg1: i32) -> (i32, i32) {
    %c0_i32 = arith.constant 0 : i32
    %c0_i32_0 = arith.constant 0 : i32
    %c0_i32_1 = arith.constant 0 : i32
    return %c0_i32, %c0_i32_0 : i32, i32
  }
  func.func @transform_3(%arg0: i32, %arg1: i32) -> (i32, i32) {
    %c0_i32 = arith.constant 0 : i32
    %c0_i32_0 = arith.constant 0 : i32
    %c0_i32_1 = arith.constant 0 : i32
    return %c0_i32, %c0_i32_0 : i32, i32
  }
  func.func @transform_4(%arg0: i32, %arg1: i32) -> (i32, i32) {
    %c0_i32 = arith.constant 0 : i32
    %c0_i32_0 = arith.constant 0 : i32
    %c0_i32_1 = arith.constant 0 : i32
    return %c0_i32, %c0_i32_0 : i32, i32
  }
  func.func @transform_5(%arg0: i32, %arg1: i32) -> (i32, i32, i32) {
    %c0_i32 = arith.constant 0 : i32
    %c0_i32_0 = arith.constant 0 : i32
    return %arg0, %arg1, %c0_i32 : i32, i32, i32
  }
  func.func @transform_6(%arg0: i32, %arg1: i32) -> (i32, i32, i32) {
    %c0_i32 = arith.constant 0 : i32
    %c0_i32_0 = arith.constant 0 : i32
    return %arg0, %arg1, %c0_i32 : i32, i32, i32
  }
}

</mosaic_0001>

<bundles_post_ra>
// kernel: tpu_custom_call.1
= control target key start
LH: loop header
LB: loop body
LE: loop exit
PB: predicated region body
PF: predicated region fallthrough
CT: control target
= control target key end

     0   :  { %12 = vsyncpa [#allocation3], 0  ;;  %s1318_s0 = inlined_call_operand.hbm [shape: f32[2,8,32], index: 0, kind: input, shape index: {}]   ;;  %s1319_s1 = inlined_call_operand.hbm [shape: bf16[32,32], index: 1, kind: input, shape index: {}]   ;;  %s1320_s2 = inlined_call_operand.vmem [shape: f32[1,32], index: 2, kind: input, shape index: {}]   ;;  %s1321_s3 = inlined_call_operand.hbm [shape: bf16[32,32], index: 3, kind: input, shape index: {}]   ;;  %s1322_s4 = inlined_call_operand.vmem [shape: f32[1,32], index: 4, kind: input, shape index: {}]   ;;  %s1323_s5 = inlined_call_operand.hbm [shape: bf16[2,8,32], index: 5, kind: output, shape index: {0}]   ;;  %s1324_s6 = inlined_call_operand.hbm [shape: bf16[2,8,32], index: 6, kind: output, shape index: {1}]  }
   0x1   :  { %14 = vsyncpa [#allocation3 + $0x1], 0 }
   0x2   :  { %15 = vsyncpa [#allocation6], 0 }
   0x3   :  { %16 = vsyncpa [#allocation4], 0 }
   0x4   :  { %18 = vsyncpa [#allocation4 + $0x1], 0 }
   0x5   :  { %19 = vsyncpa [#allocation10], 0 }
   0x6   :  { %21 = vsyncpa [#allocation10 + $0x1], 0  ;;  %s1026_s21 = smov 0   ;;  %s1028_s22 = smov 0  }
   0x7   :  { %s1030_s23 = smov 0   ;;  %s1032_s24 = smov 0  }
   0x8   :  { %s1034_s25 = smov 0   ;;  %s1036_s26 = smov 0  }
   0x9 LB: > { %s630_s27 = sadd.s32 4294967295, %s980_s26   ;;  %s631_s28 = sadd.s32 4294967294, %s980_s26   ;;  %s980_s26 = sphi %s1036_s26, %s27_s26   ;;  %s976_s25 = sphi %s1034_s25, %s1349_s25   ;;  %s972_s24 = sphi %s1032_s24, %s1348_s24   ;;  %s968_s23 = sphi %s1030_s23, %s1347_s23   ;;  %s964_s22 = sphi %s1028_s22, %s1346_s22   ;;  %s960_s21 = sphi %s1026_s21, %s1345_s21  }
   0xa   : > { %p61_p0 = scmp.ne.s32.totalorder %s964_s22, %s960_s21  ;;  %p1060_p1 = scmp.eq.s32.totalorder %s630_s27, 0 }
   0xb   : > { %p1064_p2 = scmp.eq.s32.totalorder %s630_s27, 1  ;;  %p177_p3 = scmp.eq.s32.totalorder %s631_s28, 1 }
   0xc   : > { %s1330_s29 = scalar_select %p1060_p1, 1, 0 }
   0xd   : > { %p1070_p4 = por %p1060_p1, %p61_p0  ;;  %p632_p5 = scmp.ge.s32.totalorder %s980_s26, 1 }
   0xe   : > { %p1075_p6 = por %p177_p3, %p61_p0  ;;  %p212_p7 = scmp.lt.s32.totalorder %s980_s26, 3 }
   0xf   : > { %s1332_s7 = scalar_select %p1070_p4, 1, 0 }
  0x10   : > { %s1333_s8 = scalar_select %p1075_p6, 1, 0 }
  0x11   : > { %p1080_p8 = pnand %p632_p5, %p212_p7  ;;  %s982_s10 = smov [#allocation5]  }
  0x12   : > { %1334 = sst [smem:[#allocation15_spill]] %s1333_s8  ;;  %s224_s11 = sshll.u32 %s982_s10, 4  ;;  %s1084_s11 = int_to_ptr.vmem [resolvable:$true] %s224_s11 }
  0x13   : > { %p694_p9 = pneg %p1080_p8  ;;  %s983_s13 = smov [#allocation7]  }
  0x14   : > { %s240_s14 = sshll.u32 %s983_s13, 4  ;;  %s776_s17 = scalar_lea.hbm %s1319_s1, 256  ;;  %s1095_s14 = int_to_ptr.vmem [resolvable:$true] %s240_s14 }
  0x15   : > { %p1091_p11 = pnand %p694_p9, %p1060_p1  ;;  %p777_p12 = scmp.ne.s32.totalorder %s1319_s1, %s776_s17 }
  0x16   : > { %p783_p5 = scmp.lt.u32.totalorder %s776_s17, %s1319_s1 }
  0x17   : > { %p778_p13 = pneg %p1091_p11 }
  0x19   : > { %p779_p0 = pnand %p778_p13, %p777_p12 }
  0x1b   : > { %p780_p3 = pneg %p779_p0 }
  0x1d   : > { %p785_p7 = pnand %p783_p5, %p780_p3 }
  0x1f   : > { %788 = shalt.err (!%p785_p7)
}
  0x20   : > { %s789_s28 = scalar_lea.vmem %s1084_s11, 256  ;;  %p797_p1 = scmp.lt.s32.totalorder %s1084_s11, %s1084_s11 }
  0x21   : > { %p790_p9 = scmp.ne.s32.totalorder %s1084_s11, %s789_s28  ;;  %p798_p12 = scmp.lt.s32.totalorder %s789_s28, %s789_s28 }
  0x23   : > { %p792_p10 = pnand %p790_p9, %p778_p13  ;;  %p799_p0 = por %p798_p12, %p797_p1 }
  0x25   : > { %p793_p6 = pneg %p792_p10 }
  0x27   : > { %p800_p4 = pnand %p799_p0, %p793_p6 }
  0x29   : > { %803 = shalt.err (!%p800_p4)
}
  0x2a   : > { %s984_s10 = smov 64   ;;  %s985_s13 = smov 4  }
  0x2b   : > { %697 = dma.hbm_to_vmem [thread:$0]  (!%p1091_p11), %s1319_s1, 256, %s1084_s11, [#allocation6], %s984_s10, %s984_s10, %s985_s13  }
  0x2c   : > { %s804_s19 = scalar_lea.hbm %s1321_s3, 256 }
  0x2d   : > { %p805_p1 = scmp.ne.s32.totalorder %s1321_s3, %s804_s19  ;;  %p811_p10 = scmp.lt.u32.totalorder %s804_s19, %s1321_s3 }
  0x2f   : > { %p807_p4 = pnand %p805_p1, %p778_p13 }
  0x31   : > { %p808_p6 = pneg %p807_p4 }
  0x33   : > { %p813_p3 = pnand %p811_p10, %p808_p6 }
  0x35   : > { %816 = shalt.err (!%p813_p3)
}
  0x36   : > { %s817_s11 = scalar_lea.vmem %s1095_s14, 256  ;;  %p825_p12 = scmp.lt.s32.totalorder %s1095_s14, %s1095_s14 }
  0x37   : > { %p818_p5 = scmp.ne.s32.totalorder %s1095_s14, %s817_s11  ;;  %p826_p0 = scmp.lt.s32.totalorder %s817_s11, %s817_s11 }
  0x39   : > { %p820_p7 = pnand %p818_p5, %p778_p13  ;;  %p827_p1 = por %p826_p0, %p825_p12 }
  0x3b   : > { %p821_p9 = pneg %p820_p7 }
  0x3d   : > { %p828_p4 = pnand %p827_p1, %p821_p9 }
  0x3f   : > { %831 = shalt.err (!%p828_p4)
}
  0x40   : > { %700 = dma.hbm_to_vmem [thread:$0]  (!%p1091_p11), %s1321_s3, 256, %s1095_s14, [#allocation6], %s984_s10, %s984_s10, %s985_s13  }
  0x41   : > { %s39_s16 = sadd.s32 1, %s976_s25  ;;  %s48_s17 = sadd.s32 1, %s968_s23 }
  0x42   : > { %p41_p13 = scmp.ge.s32.totalorder %s39_s16, 2  ;;  %p55_p6 = scmp.ne.s32.totalorder %s968_s23, %s964_s22 }
  0x43   : > { %p56_p10 = scmp.eq.s32.totalorder %s980_s26, 0  ;;  %p714_p3 = scmp.lt.s32.totalorder %s980_s26, 2 }
  0x44   : > { %s1351_s16 = smov (%p41_p13, %s39_s16), 0  ;;  %p1159_p7 = por %p1064_p2, %p55_p6 }
  0x45   : > { %p57_p5 = por %p56_p10, %p55_p6  ;;  %s43_s18 = ssub.s32 %s976_s25, %s1351_s16 }
  0x46   : > { %s1337_s12 = scalar_select %p1159_p7, 1, 0 }
  0x47   : > { %s257_s19 = sand.u32 1, %s968_s23   ;;  %p46_p9 = scmp.eq.s32.totalorder %s43_s18, 0 }
  0x48   : > { %s636_s14 = sshll.u32 %s257_s19, 3  ;;  %s637_s10 = sshll.u32 %s976_s25, 7 }
  0x49   : > { %s1168_s13 = scalar_select %p46_p9, %s968_s23, %s48_s17  }
  0x4a   : > { %s1173_s28 = scalar_lea.hbm %s1318_s0, %s637_s10  ;;  %s261_s30 = scalar_lea.vmem [#allocation2], %s636_s14 }
  0x4b   : > { %s269_s11 = sshll.u32 %s261_s30, 4  ;;  %p1177_p2 = pnand %p714_p3, %p57_p5  ;;  %s1181_s11 = int_to_ptr.vmem [resolvable:$true] %s269_s11 }
  0x4c   : > { %s258_s15 = scalar_lea.sflag [#allocation3], %s257_s19  ;;  %s832_s17 = scalar_lea.hbm %s1173_s28, 128 }
  0x4d   : > { %p833_p11 = scmp.ne.s32.totalorder %s1173_s28, %s832_s17  ;;  %p834_p12 = pneg %p1177_p2 }
  0x4e   : > { %s837_s10 = scalar_lea.hbm %s1318_s0, 256  ;;  %p838_p4 = scmp.lt.u32.totalorder %s1173_s28, %s1318_s0 }
  0x4f   : > { %p835_p0 = pnand %p834_p12, %p833_p11  ;;  %p839_p13 = scmp.lt.u32.totalorder %s837_s10, %s832_s17 }
  0x50   : > { %p841_p10 = scmp.lt.u32.totalorder %s832_s17, %s1173_s28 }
  0x51   : > { %p836_p1 = pneg %p835_p0  ;;  %p840_p6 = por %p839_p13, %p838_p4 }
  0x53   : > { %p842_p3 = por %p841_p10, %p840_p6 }
  0x55   : > { %p843_p5 = pnand %p842_p3, %p836_p1 }
  0x57   : > { %846 = shalt.err (!%p843_p5)
}
  0x58   : > { %s847_s19 = scalar_lea.vmem %s1181_s11, 128  ;;  %s986_s30 = smov [#allocation2]  }
  0x59   : > { %p848_p9 = scmp.ne.s32.totalorder %s1181_s11, %s847_s19  ;;  %s852_s18 = sshll.u32 %s986_s30, 4  ;;  %s853_s18 = int_to_ptr.vmem [resolvable:$false] %s852_s18 }
  0x5a   : > { %s854_s14 = scalar_lea.vmem %s853_s18, 256  ;;  %p855_p7 = scmp.lt.s32.totalorder %s1181_s11, %s853_s18 }
  0x5b   : > { %p850_p11 = pnand %p848_p9, %p834_p12  ;;  %p856_p4 = scmp.lt.s32.totalorder %s854_s14, %s847_s19 }
  0x5d   : > { %p851_p0 = pneg %p850_p11  ;;  %p857_p13 = por %p856_p4, %p855_p7 }
  0x5f   : > { %p858_p6 = pnand %p857_p13, %p851_p0 }
  0x61   : > { %861 = shalt.err (!%p858_p6)
}
  0x62   : > { %704 = dma.hbm_to_vmem [thread:$0]  (!%p1177_p2), %s1173_s28, 128, %s1181_s11, %s258_s15  }
  0x63   : > { %278 = sbr.rel (%p1080_p8) target bundleno = 373 (0x175), region = 40  ;;  %s1211_s17 = sand.u32 (!%p1080_p8), 1, %s964_s22  }
  0x64   : > { %s639_s10 = sshll.u32 (!%p1080_p8), %s1211_s17, 3  ;;  %s281_s20 = scalar_lea.sflag (!%p1080_p8), [#allocation3], %s1211_s17 }
  0x65   : > { %s284_s27 = scalar_lea.vmem (!%p1080_p8), [#allocation2], %s639_s10  ;;  %p1339_p7 = scmp.ne.s32.totalorder (!%p1080_p8), %s1332_s7, 0 }
  0x6a   : > { %943 = dma.done.wait (%p1339_p7), %s281_s20, 128  }
  0x6b   : > { %945 = vsyncadd (%p1339_p7), %s281_s20, 4294967168  ;;  %p1340_p12 = scmp.ne.s32.totalorder %s1330_s29, 0 }
  0x6d   : > { %947 = dma.done.wait (%p1340_p12), [#allocation6], 512  }
  0x6e   : > { %949 = vsyncadd (%p1340_p12), [#allocation6], 4294966784  ;;  %v987_v0 = vmov 0.0   ;;  %vm988_vm0 = vmmov 0   ;;  %v772_v1 = vld [vmem:[#allocation5] sm:$0xff]   ;;  %v773_v2 = vld [vmem:[#allocation7] sm:$0xff]  }
  0x6f   : > { %664 = vmatprep.subr.bf16.mxu0 %v987_v0  ;;  %672 = vmatprep.subr.bf16.mxu1 %v987_v0  ;;  %v774_v3 = vld [vmem:[#allocation5 + $0x8] sm:$0xff]   ;;  %v775_v4 = vld [vmem:[#allocation7 + $0x8] sm:$0xff]   ;;  %vm352_vm1 = vcmask 261120   ;;  %s642_s29 = sshll.u32 %s1211_s17, 2  ;;  %v644_v7 = vld [vmem:[%s1320_s2] ss:$0 sm:$0xff] }
  0x70   : > { %668 = vmatprep.mubr.msk.bf16.mxu0 %vm988_vm0, %v987_v0  ;;  %676 = vmatprep.mubr.msk.bf16.mxu1 %vm988_vm0, %v987_v0  ;;  %v327_v5 = vld [vmem:[%s284_s27] sm:$0xff]  ;;  %s654_s8 = sshll.u32 %s972_s24, 6  ;;  %s318_s15 = scalar_lea.vmem [#allocation8], %s642_s29  ;;  %vm460_vm2 = vcmask 257024  }
  0x71   : > { %665 = vmatpush3.bf16.msra.mxu0 %v772_v1  ;;  %673 = vmatpush3.bf16.msra.mxu1 %v773_v2  ;;  %v328_v6 = vpack.c.bf16 %v327_v5, %v327_v5  ;;  %v648_v8 = vld [vmem:[%s1322_s4] ss:$0 sm:$0xff]  ;;  %s484_s19 = sshll.u32 %s318_s15, 4  ;;  %s1231_s30 = scalar_lea.vmem [#allocation9], %s642_s29  ;;  %s1239_s19 = int_to_ptr.vmem [resolvable:$true] %s484_s19 }
  0x72   : > { %666 = vmatprep.subr.bf16.mxu0 %v987_v0  ;;  %674 = vmatprep.subr.bf16.mxu1 %v987_v0  ;;  %s498_s18 = sshll.u32 %s1231_s30, 4  ;;  %s1237_s24 = scalar_lea.hbm %s1323_s5, %s654_s8  ;;  %s1246_s18 = int_to_ptr.vmem [resolvable:$true] %s498_s18 }
  0x73   : > { %s1244_s29 = scalar_lea.hbm %s1324_s6, %s654_s8  ;;  %s465_s7 = scalar_lea.sflag [#allocation4], %s1211_s17 }
  0x74   : > { %s862_s9 = scalar_lea.vmem %s1239_s19, 64  ;;  %p1341_p2 = scmp.ne.s32.totalorder %s1337_s12, 0 }
  0x75   : > { %667 = vmatpush3.bf16.msra.mxu0 %v774_v3  ;;  %675 = vmatpush3.bf16.msra.mxu1 %v775_v4  ;;  %p863_p8 = scmp.ne.s32.totalorder %s1239_s19, %s862_s9  ;;  %s989_s28 = smov [#allocation8]  }
  0x76   : > { %s866_s11 = sshll.u32 %s989_s28, 4  ;;  %s867_s11 = int_to_ptr.vmem [resolvable:$false] %s866_s11 }
  0x77   : > { %p864_p1 = pnand %p863_p8, %p1341_p2  ;;  %s868_s14 = scalar_lea.vmem %s867_s11, 128 }
  0x78   : > { %669 = vmatmul.mubr.msk.bf16.vlgmr.msra.gmra.mrb[0].mxu0 %vm352_vm1, %v328_v6  ;;  %677 = vmatmul.mubr.msk.bf16.vlgmr.msra.gmra.mrb[0].mxu1 %vm352_vm1, %v328_v6  ;;  %p869_p3 = scmp.lt.s32.totalorder %s1239_s19, %s867_s11  ;;  %p870_p5 = scmp.lt.s32.totalorder %s868_s14, %s862_s9 }
  0x79   : > { %p865_p10 = pneg %p864_p1 }
  0x7a   : > { %p871_p9 = por %p870_p5, %p869_p3 }
  0x7c   : > { %p872_p11 = pnand %p871_p9, %p865_p10 }
 0x14b   : > { %v390_v9 = vpop.f32.mrb[0].mxu0  ;;  %v453_v11 = vpop.f32.mrb[0].mxu1 }
 0x14c   : > { %v391_v10 = vadd.f32 %v644_v7, %v390_v9  ;;  %v670_v12 = vpop.f32.mrb[1].mxu0  ;;  %v454_v13 = vadd.f32 %v648_v8, %v453_v11  ;;  %v678_v14 = vpop.f32.mrb[1].mxu1 }
 0x14d   : > { %v393_v15 = vpop.f32.mrb[2].mxu0  ;;  %v456_v17 = vpop.f32.mrb[2].mxu1 }
 0x14e   : > { %v459_v16 = vpack.c.bf16 %v391_v10, %v391_v10  ;;  %v671_v18 = vpop.f32.mrb[3].mxu0  ;;  %v462_v19 = vpack.c.bf16 %v454_v13, %v454_v13  ;;  %v679_v20 = vpop.f32.mrb[3].mxu1 }
 0x150   : > { %461 = vst.msk [vmem:[%s318_s15] sm:$0xf] %vm460_vm2, %v459_v16 }
 0x151   : > { %875 = shalt.err (!%p872_p11)
}
 0x152   : > { %s876_s8 = scalar_lea.hbm %s1237_s24, 64  ;;  %s880_s20 = scalar_lea.hbm %s1323_s5, 128 }
 0x153   : > { %p877_p0 = scmp.ne.s32.totalorder %s1237_s24, %s876_s8  ;;  %p881_p6 = scmp.lt.u32.totalorder %s1237_s24, %s1323_s5 }
 0x154   : > { %p882_p7 = scmp.lt.u32.totalorder %s880_s20, %s876_s8  ;;  %p884_p8 = scmp.lt.u32.totalorder %s876_s8, %s1237_s24 }
 0x155   : > { %p878_p4 = pnand %p877_p0, %p1341_p2 }
 0x156   : > { %p883_p12 = por %p882_p7, %p881_p6 }
 0x157   : > { %p879_p13 = pneg %p878_p4 }
 0x158   : > { %p885_p1 = por %p884_p8, %p883_p12 }
 0x15a   : > { %p886_p10 = pnand %p885_p1, %p879_p13 }
 0x15c   : > { %889 = shalt.err (!%p886_p10)
}
 0x15d   : > { %690 = dma.vmem_to_hbm [thread:$0]  (%p1341_p2), %s1239_s19, 64, %s1237_s24, %s465_s7   ;;  %463 = vst.msk [vmem:[%s1231_s30] sm:$0xf] %vm460_vm2, %v462_v19 }
 0x15e   : > { %s470_s9 = scalar_lea.sflag [#allocation10], %s1211_s17  ;;  %s890_s11 = scalar_lea.vmem %s1246_s18, 64 }
 0x15f   : > { %p891_p3 = scmp.ne.s32.totalorder %s1246_s18, %s890_s11  ;;  %s990_s14 = smov [#allocation9]  }
 0x160   : > { %s894_s8 = sshll.u32 %s990_s14, 4  ;;  %s895_s8 = int_to_ptr.vmem [resolvable:$false] %s894_s8 }
 0x161   : > { %p892_p5 = pnand %p891_p3, %p1341_p2  ;;  %s896_s15 = scalar_lea.vmem %s895_s8, 128 }
 0x162   : > { %p897_p11 = scmp.lt.s32.totalorder %s1246_s18, %s895_s8  ;;  %p898_p0 = scmp.lt.s32.totalorder %s896_s15, %s890_s11 }
 0x163   : > { %p893_p9 = pneg %p892_p5 }
 0x164   : > { %p899_p4 = por %p898_p0, %p897_p11 }
 0x166   : > { %p900_p13 = pnand %p899_p4, %p893_p9 }
 0x168   : > { %903 = shalt.err (!%p900_p13)
}
 0x169   : > { %s904_s17 = scalar_lea.hbm %s1244_s29, 64  ;;  %s908_s24 = scalar_lea.hbm %s1324_s6, 128 }
 0x16a   : > { %p905_p6 = scmp.ne.s32.totalorder %s1244_s29, %s904_s17  ;;  %p909_p8 = scmp.lt.u32.totalorder %s1244_s29, %s1324_s6 }
 0x16b   : > { %p910_p1 = scmp.lt.u32.totalorder %s908_s24, %s904_s17  ;;  %p912_p3 = scmp.lt.u32.totalorder %s904_s17, %s1244_s29 }
 0x16c   : > { %p906_p7 = pnand %p905_p6, %p1341_p2 }
 0x16d   : > { %p911_p10 = por %p910_p1, %p909_p8 }
 0x16e   : > { %p907_p12 = pneg %p906_p7 }
 0x16f   : > { %p913_p5 = por %p912_p3, %p911_p10 }
 0x171   : > { %p914_p9 = pnand %p913_p5, %p907_p12 }
 0x173   : > { %917 = shalt.err (!%p914_p9)
}
 0x174   : > { %691 = dma.vmem_to_hbm [thread:$0]  (%p1341_p2), %s1246_s18, 64, %s1244_s29, %s470_s9  }
 0x175 PF: > { %s1342_s20 = sld [smem:[#allocation15_spill]]  ;;  %s510_s27 = sand.u32 1, %s960_s21  }
 0x176   : > { %p1344_p0 = scmp.ge.s32.totalorder %s980_s26, 2  ;;  %s511_s28 = scalar_lea.sflag [#allocation4], %s510_s27 }
 0x17b   : > { %p1343_p11 = scmp.ne.s32.totalorder %s1342_s20, 0 }
 0x17d   : > { %p706_p4 = pnand %p1344_p0, %p1343_p11 }
 0x17f   : > { %951 = dma.done.wait (!%p706_p4), %s511_s28, 64  }
 0x180   : > { %953 = vsyncadd (!%p706_p4), %s511_s28, 4294967232  ;;  %s520_s11 = scalar_lea.sflag [#allocation10], %s510_s27 }
 0x181   : > { %955 = dma.done.wait (!%p706_p4), %s520_s11, 64  }
 0x182   : > { %957 = vsyncadd (!%p706_p4), %s520_s11, 4294967232  ;;  %s27_s26 = sadd.s32 1, %s980_s26   ;;  %s1345_s21 = smov %s964_s22 }
 0x183   : > { %p24_p13 = scmp.ge.s32.totalorder %s27_s26, 4   ;;  %s1346_s22 = smov %s968_s23 }
 0x184   : > { %s1347_s23 = smov %s1168_s13  ;;  %s1348_s24 = smov %s976_s25 }
 0x185   : > { %s1349_s25 = smov %s1351_s16  ;;  %26 = sbr.rel (!%p24_p13) target bundleno = 9 (0x9), region = 110 }
 0x18c   :  { %525 = vsyncpa [#allocation3], 1 }
 0x18d   :  { %527 = vsyncpa [#allocation3 + $0x1], 1 }
 0x18e   :  { %528 = vsyncpa [#allocation6], 1 }
 0x18f   :  { %529 = vsyncpa [#allocation4], 1 }
 0x190   :  { %531 = vsyncpa [#allocation4 + $0x1], 1 }
 0x191   :  { %532 = vsyncpa [#allocation10], 1 }
 0x192   :  { %534 = vsyncpa [#allocation10 + $0x1], 1 }

// kernel: tpu_custom_call.1
= control target key start
LH: loop header
LB: loop body
LE: loop exit
PB: predicated region body
PF: predicated region fallthrough
CT: control target
= control target key end

     0   :  { %12 = vsyncpa [#allocation3], 0  ;;  %s1318_s0 = inlined_call_operand.hbm [shape: f32[2,8,32], index: 0, kind: input, shape index: {}]   ;;  %s1319_s1 = inlined_call_operand.hbm [shape: bf16[32,32], index: 1, kind: input, shape index: {}]   ;;  %s1320_s2 = inlined_call_operand.vmem [shape: f32[1,32], index: 2, kind: input, shape index: {}]   ;;  %s1321_s3 = inlined_call_operand.hbm [shape: bf16[32,32], index: 3, kind: input, shape index: {}]   ;;  %s1322_s4 = inlined_call_operand.vmem [shape: f32[1,32], index: 4, kind: input, shape index: {}]   ;;  %s1323_s5 = inlined_call_operand.hbm [shape: bf16[2,8,32], index: 5, kind: output, shape index: {0}]   ;;  %s1324_s6 = inlined_call_operand.hbm [shape: bf16[2,8,32], index: 6, kind: output, shape index: {1}]  }
   0x1   :  { %14 = vsyncpa [#allocation3 + $0x1], 0 }
   0x2   :  { %15 = vsyncpa [#allocation6], 0 }
   0x3   :  { %16 = vsyncpa [#allocation4], 0 }
   0x4   :  { %18 = vsyncpa [#allocation4 + $0x1], 0 }
   0x5   :  { %19 = vsyncpa [#allocation10], 0 }
   0x6   :  { %21 = vsyncpa [#allocation10 + $0x1], 0  ;;  %s1026_s21 = smov 0   ;;  %s1028_s22 = smov 0  }
   0x7   :  { %s1030_s23 = smov 0   ;;  %s1032_s24 = smov 0  }
   0x8   :  { %s1034_s25 = smov 0   ;;  %s1036_s26 = smov 0  }
   0x9 LB: > { %s630_s27 = sadd.s32 4294967295, %s980_s26   ;;  %s631_s28 = sadd.s32 4294967294, %s980_s26   ;;  %s980_s26 = sphi %s1036_s26, %s27_s26   ;;  %s976_s25 = sphi %s1034_s25, %s1349_s25   ;;  %s972_s24 = sphi %s1032_s24, %s1348_s24   ;;  %s968_s23 = sphi %s1030_s23, %s1347_s23   ;;  %s964_s22 = sphi %s1028_s22, %s1346_s22   ;;  %s960_s21 = sphi %s1026_s21, %s1345_s21  }
   0xa   : > { %p61_p0 = scmp.ne.s32.totalorder %s964_s22, %s960_s21  ;;  %p1060_p1 = scmp.eq.s32.totalorder %s630_s27, 0 }
   0xb   : > { %p1064_p2 = scmp.eq.s32.totalorder %s630_s27, 1  ;;  %p177_p3 = scmp.eq.s32.totalorder %s631_s28, 1 }
   0xc   : > { %s1330_s29 = scalar_select %p1060_p1, 1, 0 }
   0xd   : > { %p1070_p4 = por %p1060_p1, %p61_p0  ;;  %p632_p5 = scmp.ge.s32.totalorder %s980_s26, 1 }
   0xe   : > { %p1075_p6 = por %p177_p3, %p61_p0  ;;  %p212_p7 = scmp.lt.s32.totalorder %s980_s26, 3 }
   0xf   : > { %s1332_s7 = scalar_select %p1070_p4, 1, 0 }
  0x10   : > { %s1333_s8 = scalar_select %p1075_p6, 1, 0 }
  0x11   : > { %p1080_p8 = pnand %p632_p5, %p212_p7  ;;  %s982_s10 = smov [#allocation5]  }
  0x12   : > { %1334 = sst [smem:[#allocation15_spill]] %s1333_s8  ;;  %s224_s11 = sshll.u32 %s982_s10, 4  ;;  %s1084_s11 = int_to_ptr.vmem [resolvable:$true] %s224_s11 }
  0x13   : > { %p694_p9 = pneg %p1080_p8  ;;  %s983_s13 = smov [#allocation7]  }
  0x14   : > { %s240_s14 = sshll.u32 %s983_s13, 4  ;;  %s776_s17 = scalar_lea.hbm %s1319_s1, 256  ;;  %s1095_s14 = int_to_ptr.vmem [resolvable:$true] %s240_s14 }
  0x15   : > { %p1091_p11 = pnand %p694_p9, %p1060_p1  ;;  %p777_p12 = scmp.ne.s32.totalorder %s1319_s1, %s776_s17 }
  0x16   : > { %p783_p5 = scmp.lt.u32.totalorder %s776_s17, %s1319_s1 }
  0x17   : > { %p778_p13 = pneg %p1091_p11 }
  0x19   : > { %p779_p0 = pnand %p778_p13, %p777_p12 }
  0x1b   : > { %p780_p3 = pneg %p779_p0 }
  0x1d   : > { %p785_p7 = pnand %p783_p5, %p780_p3 }
  0x1f   : > { %788 = shalt.err (!%p785_p7)
}
  0x20   : > { %s789_s28 = scalar_lea.vmem %s1084_s11, 256  ;;  %p797_p1 = scmp.lt.s32.totalorder %s1084_s11, %s1084_s11 }
  0x21   : > { %p790_p9 = scmp.ne.s32.totalorder %s1084_s11, %s789_s28  ;;  %p798_p12 = scmp.lt.s32.totalorder %s789_s28, %s789_s28 }
  0x23   : > { %p792_p10 = pnand %p790_p9, %p778_p13  ;;  %p799_p0 = por %p798_p12, %p797_p1 }
  0x25   : > { %p793_p6 = pneg %p792_p10 }
  0x27   : > { %p800_p4 = pnand %p799_p0, %p793_p6 }
  0x29   : > { %803 = shalt.err (!%p800_p4)
}
  0x2a   : > { %s984_s10 = smov 64   ;;  %s985_s13 = smov 4  }
  0x2b   : > { %697 = dma.hbm_to_vmem [thread:$0]  (!%p1091_p11), %s1319_s1, 256, %s1084_s11, [#allocation6], %s984_s10, %s984_s10, %s985_s13  }
  0x2c   : > { %s804_s19 = scalar_lea.hbm %s1321_s3, 256 }
  0x2d   : > { %p805_p1 = scmp.ne.s32.totalorder %s1321_s3, %s804_s19  ;;  %p811_p10 = scmp.lt.u32.totalorder %s804_s19, %s1321_s3 }
  0x2f   : > { %p807_p4 = pnand %p805_p1, %p778_p13 }
  0x31   : > { %p808_p6 = pneg %p807_p4 }
  0x33   : > { %p813_p3 = pnand %p811_p10, %p808_p6 }
  0x35   : > { %816 = shalt.err (!%p813_p3)
}
  0x36   : > { %s817_s11 = scalar_lea.vmem %s1095_s14, 256  ;;  %p825_p12 = scmp.lt.s32.totalorder %s1095_s14, %s1095_s14 }
  0x37   : > { %p818_p5 = scmp.ne.s32.totalorder %s1095_s14, %s817_s11  ;;  %p826_p0 = scmp.lt.s32.totalorder %s817_s11, %s817_s11 }
  0x39   : > { %p820_p7 = pnand %p818_p5, %p778_p13  ;;  %p827_p1 = por %p826_p0, %p825_p12 }
  0x3b   : > { %p821_p9 = pneg %p820_p7 }
  0x3d   : > { %p828_p4 = pnand %p827_p1, %p821_p9 }
  0x3f   : > { %831 = shalt.err (!%p828_p4)
}
  0x40   : > { %700 = dma.hbm_to_vmem [thread:$0]  (!%p1091_p11), %s1321_s3, 256, %s1095_s14, [#allocation6], %s984_s10, %s984_s10, %s985_s13  }
  0x41   : > { %s39_s16 = sadd.s32 1, %s976_s25  ;;  %s48_s17 = sadd.s32 1, %s968_s23 }
  0x42   : > { %p41_p13 = scmp.ge.s32.totalorder %s39_s16, 2  ;;  %p55_p6 = scmp.ne.s32.totalorder %s968_s23, %s964_s22 }
  0x43   : > { %p56_p10 = scmp.eq.s32.totalorder %s980_s26, 0  ;;  %p714_p3 = scmp.lt.s32.totalorder %s980_s26, 2 }
  0x44   : > { %s1351_s16 = smov (%p41_p13, %s39_s16), 0  ;;  %p1159_p7 = por %p1064_p2, %p55_p6 }
  0x45   : > { %p57_p5 = por %p56_p10, %p55_p6  ;;  %s43_s18 = ssub.s32 %s976_s25, %s1351_s16 }
  0x46   : > { %s1337_s12 = scalar_select %p1159_p7, 1, 0 }
  0x47   : > { %s257_s19 = sand.u32 1, %s968_s23   ;;  %p46_p9 = scmp.eq.s32.totalorder %s43_s18, 0 }
  0x48   : > { %s636_s14 = sshll.u32 %s257_s19, 3  ;;  %s637_s10 = sshll.u32 %s976_s25, 7 }
  0x49   : > { %s1168_s13 = scalar_select %p46_p9, %s968_s23, %s48_s17  }
  0x4a   : > { %s1173_s28 = scalar_lea.hbm %s1318_s0, %s637_s10  ;;  %s261_s30 = scalar_lea.vmem [#allocation2], %s636_s14 }
  0x4b   : > { %s269_s11 = sshll.u32 %s261_s30, 4  ;;  %p1177_p2 = pnand %p714_p3, %p57_p5  ;;  %s1181_s11 = int_to_ptr.vmem [resolvable:$true] %s269_s11 }
  0x4c   : > { %s258_s15 = scalar_lea.sflag [#allocation3], %s257_s19  ;;  %s832_s17 = scalar_lea.hbm %s1173_s28, 128 }
  0x4d   : > { %p833_p11 = scmp.ne.s32.totalorder %s1173_s28, %s832_s17  ;;  %p834_p12 = pneg %p1177_p2 }
  0x4e   : > { %s837_s10 = scalar_lea.hbm %s1318_s0, 256  ;;  %p838_p4 = scmp.lt.u32.totalorder %s1173_s28, %s1318_s0 }
  0x4f   : > { %p835_p0 = pnand %p834_p12, %p833_p11  ;;  %p839_p13 = scmp.lt.u32.totalorder %s837_s10, %s832_s17 }
  0x50   : > { %p841_p10 = scmp.lt.u32.totalorder %s832_s17, %s1173_s28 }
  0x51   : > { %p836_p1 = pneg %p835_p0  ;;  %p840_p6 = por %p839_p13, %p838_p4 }
  0x53   : > { %p842_p3 = por %p841_p10, %p840_p6 }
  0x55   : > { %p843_p5 = pnand %p842_p3, %p836_p1 }
  0x57   : > { %846 = shalt.err (!%p843_p5)
}
  0x58   : > { %s847_s19 = scalar_lea.vmem %s1181_s11, 128  ;;  %s986_s30 = smov [#allocation2]  }
  0x59   : > { %p848_p9 = scmp.ne.s32.totalorder %s1181_s11, %s847_s19  ;;  %s852_s18 = sshll.u32 %s986_s30, 4  ;;  %s853_s18 = int_to_ptr.vmem [resolvable:$false] %s852_s18 }
  0x5a   : > { %s854_s14 = scalar_lea.vmem %s853_s18, 256  ;;  %p855_p7 = scmp.lt.s32.totalorder %s1181_s11, %s853_s18 }
  0x5b   : > { %p850_p11 = pnand %p848_p9, %p834_p12  ;;  %p856_p4 = scmp.lt.s32.totalorder %s854_s14, %s847_s19 }
  0x5d   : > { %p851_p0 = pneg %p850_p11  ;;  %p857_p13 = por %p856_p4, %p855_p7 }
  0x5f   : > { %p858_p6 = pnand %p857_p13, %p851_p0 }
  0x61   : > { %861 = shalt.err (!%p858_p6)
}
  0x62   : > { %704 = dma.hbm_to_vmem [thread:$0]  (!%p1177_p2), %s1173_s28, 128, %s1181_s11, %s258_s15  }
  0x63   : > { %278 = sbr.rel (%p1080_p8) target bundleno = 373 (0x175), region = 40  ;;  %s1211_s17 = sand.u32 (!%p1080_p8), 1, %s964_s22  }
  0x64   : > { %s639_s10 = sshll.u32 (!%p1080_p8), %s1211_s17, 3  ;;  %s281_s20 = scalar_lea.sflag (!%p1080_p8), [#allocation3], %s1211_s17 }
  0x65   : > { %s284_s27 = scalar_lea.vmem (!%p1080_p8), [#allocation2], %s639_s10  ;;  %p1339_p7 = scmp.ne.s32.totalorder (!%p1080_p8), %s1332_s7, 0 }
  0x6a   : > { %943 = dma.done.wait (%p1339_p7), %s281_s20, 128  }
  0x6b   : > { %945 = vsyncadd (%p1339_p7), %s281_s20, 4294967168  ;;  %p1340_p12 = scmp.ne.s32.totalorder %s1330_s29, 0 }
  0x6d   : > { %947 = dma.done.wait (%p1340_p12), [#allocation6], 512  }
  0x6e   : > { %949 = vsyncadd (%p1340_p12), [#allocation6], 4294966784  ;;  %v987_v0 = vmov 0.0   ;;  %vm988_vm0 = vmmov 0   ;;  %v772_v1 = vld [vmem:[#allocation5] sm:$0xff]   ;;  %v773_v2 = vld [vmem:[#allocation7] sm:$0xff]  }
  0x6f   : > { %664 = vmatprep.subr.bf16.mxu0 %v987_v0  ;;  %672 = vmatprep.subr.bf16.mxu1 %v987_v0  ;;  %v774_v3 = vld [vmem:[#allocation5 + $0x8] sm:$0xff]   ;;  %v775_v4 = vld [vmem:[#allocation7 + $0x8] sm:$0xff]   ;;  %vm352_vm1 = vcmask 261120   ;;  %s642_s29 = sshll.u32 %s1211_s17, 2  ;;  %v644_v7 = vld [vmem:[%s1320_s2] ss:$0 sm:$0xff] }
  0x70   : > { %668 = vmatprep.mubr.msk.bf16.mxu0 %vm988_vm0, %v987_v0  ;;  %676 = vmatprep.mubr.msk.bf16.mxu1 %vm988_vm0, %v987_v0  ;;  %v327_v5 = vld [vmem:[%s284_s27] sm:$0xff]  ;;  %s654_s8 = sshll.u32 %s972_s24, 6  ;;  %s318_s15 = scalar_lea.vmem [#allocation8], %s642_s29  ;;  %vm460_vm2 = vcmask 257024  }
  0x71   : > { %665 = vmatpush3.bf16.msra.mxu0 %v772_v1  ;;  %673 = vmatpush3.bf16.msra.mxu1 %v773_v2  ;;  %v328_v6 = vpack.c.bf16 %v327_v5, %v327_v5  ;;  %v648_v8 = vld [vmem:[%s1322_s4] ss:$0 sm:$0xff]  ;;  %s484_s19 = sshll.u32 %s318_s15, 4  ;;  %s1231_s30 = scalar_lea.vmem [#allocation9], %s642_s29  ;;  %s1239_s19 = int_to_ptr.vmem [resolvable:$true] %s484_s19 }
  0x72   : > { %666 = vmatprep.subr.bf16.mxu0 %v987_v0  ;;  %674 = vmatprep.subr.bf16.mxu1 %v987_v0  ;;  %s498_s18 = sshll.u32 %s1231_s30, 4  ;;  %s1237_s24 = scalar_lea.hbm %s1323_s5, %s654_s8  ;;  %s1246_s18 = int_to_ptr.vmem [resolvable:$true] %s498_s18 }
  0x73   : > { %s1244_s29 = scalar_lea.hbm %s1324_s6, %s654_s8  ;;  %s465_s7 = scalar_lea.sflag [#allocation4], %s1211_s17 }
  0x74   : > { %s862_s9 = scalar_lea.vmem %s1239_s19, 64  ;;  %p1341_p2 = scmp.ne.s32.totalorder %s1337_s12, 0 }
  0x75   : > { %667 = vmatpush3.bf16.msra.mxu0 %v774_v3  ;;  %675 = vmatpush3.bf16.msra.mxu1 %v775_v4  ;;  %p863_p8 = scmp.ne.s32.totalorder %s1239_s19, %s862_s9  ;;  %s989_s28 = smov [#allocation8]  }
  0x76   : > { %s866_s11 = sshll.u32 %s989_s28, 4  ;;  %s867_s11 = int_to_ptr.vmem [resolvable:$false] %s866_s11 }
  0x77   : > { %p864_p1 = pnand %p863_p8, %p1341_p2  ;;  %s868_s14 = scalar_lea.vmem %s867_s11, 128 }
  0x78   : > { %669 = vmatmul.mubr.msk.bf16.vlgmr.msra.gmra.mrb[0].mxu0 %vm352_vm1, %v328_v6  ;;  %677 = vmatmul.mubr.msk.bf16.vlgmr.msra.gmra.mrb[0].mxu1 %vm352_vm1, %v328_v6  ;;  %p869_p3 = scmp.lt.s32.totalorder %s1239_s19, %s867_s11  ;;  %p870_p5 = scmp.lt.s32.totalorder %s868_s14, %s862_s9 }
  0x79   : > { %p865_p10 = pneg %p864_p1 }
  0x7a   : > { %p871_p9 = por %p870_p5, %p869_p3 }
  0x7c   : > { %p872_p11 = pnand %p871_p9, %p865_p10 }
 0x14b   : > { %v390_v9 = vpop.f32.mrb[0].mxu0  ;;  %v453_v11 = vpop.f32.mrb[0].mxu1 }
 0x14c   : > { %v391_v10 = vadd.f32 %v644_v7, %v390_v9  ;;  %v670_v12 = vpop.f32.mrb[1].mxu0  ;;  %v454_v13 = vadd.f32 %v648_v8, %v453_v11  ;;  %v678_v14 = vpop.f32.mrb[1].mxu1 }
 0x14d   : > { %v393_v15 = vpop.f32.mrb[2].mxu0  ;;  %v456_v17 = vpop.f32.mrb[2].mxu1 }
 0x14e   : > { %v459_v16 = vpack.c.bf16 %v391_v10, %v391_v10  ;;  %v671_v18 = vpop.f32.mrb[3].mxu0  ;;  %v462_v19 = vpack.c.bf16 %v454_v13, %v454_v13  ;;  %v679_v20 = vpop.f32.mrb[3].mxu1 }
 0x150   : > { %461 = vst.msk [vmem:[%s318_s15] sm:$0xf] %vm460_vm2, %v459_v16 }
 0x151   : > { %875 = shalt.err (!%p872_p11)
}
 0x152   : > { %s876_s8 = scalar_lea.hbm %s1237_s24, 64  ;;  %s880_s20 = scalar_lea.hbm %s1323_s5, 128 }
 0x153   : > { %p877_p0 = scmp.ne.s32.totalorder %s1237_s24, %s876_s8  ;;  %p881_p6 = scmp.lt.u32.totalorder %s1237_s24, %s1323_s5 }
 0x154   : > { %p882_p7 = scmp.lt.u32.totalorder %s880_s20, %s876_s8  ;;  %p884_p8 = scmp.lt.u32.totalorder %s876_s8, %s1237_s24 }
 0x155   : > { %p878_p4 = pnand %p877_p0, %p1341_p2 }
 0x156   : > { %p883_p12 = por %p882_p7, %p881_p6 }
 0x157   : > { %p879_p13 = pneg %p878_p4 }
 0x158   : > { %p885_p1 = por %p884_p8, %p883_p12 }
 0x15a   : > { %p886_p10 = pnand %p885_p1, %p879_p13 }
 0x15c   : > { %889 = shalt.err (!%p886_p10)
}
 0x15d   : > { %690 = dma.vmem_to_hbm [thread:$0]  (%p1341_p2), %s1239_s19, 64, %s1237_s24, %s465_s7   ;;  %463 = vst.msk [vmem:[%s1231_s30] sm:$0xf] %vm460_vm2, %v462_v19 }
 0x15e   : > { %s470_s9 = scalar_lea.sflag [#allocation10], %s1211_s17  ;;  %s890_s11 = scalar_lea.vmem %s1246_s18, 64 }
 0x15f   : > { %p891_p3 = scmp.ne.s32.totalorder %s1246_s18, %s890_s11  ;;  %s990_s14 = smov [#allocation9]  }
 0x160   : > { %s894_s8 = sshll.u32 %s990_s14, 4  ;;  %s895_s8 = int_to_ptr.vmem [resolvable:$false] %s894_s8 }
 0x161   : > { %p892_p5 = pnand %p891_p3, %p1341_p2  ;;  %s896_s15 = scalar_lea.vmem %s895_s8, 128 }
 0x162   : > { %p897_p11 = scmp.lt.s32.totalorder %s1246_s18, %s895_s8  ;;  %p898_p0 = scmp.lt.s32.totalorder %s896_s15, %s890_s11 }
 0x163   : > { %p893_p9 = pneg %p892_p5 }
 0x164   : > { %p899_p4 = por %p898_p0, %p897_p11 }
 0x166   : > { %p900_p13 = pnand %p899_p4, %p893_p9 }
 0x168   : > { %903 = shalt.err (!%p900_p13)
}
 0x169   : > { %s904_s17 = scalar_lea.hbm %s1244_s29, 64  ;;  %s908_s24 = scalar_lea.hbm %s1324_s6, 128 }
 0x16a   : > { %p905_p6 = scmp.ne.s32.totalorder %s1244_s29, %s904_s17  ;;  %p909_p8 = scmp.lt.u32.totalorder %s1244_s29, %s1324_s6 }
 0x16b   : > { %p910_p1 = scmp.lt.u32.totalorder %s908_s24, %s904_s17  ;;  %p912_p3 = scmp.lt.u32.totalorder %s904_s17, %s1244_s29 }
 0x16c   : > { %p906_p7 = pnand %p905_p6, %p1341_p2 }
 0x16d   : > { %p911_p10 = por %p910_p1, %p909_p8 }
 0x16e   : > { %p907_p12 = pneg %p906_p7 }
 0x16f   : > { %p913_p5 = por %p912_p3, %p911_p10 }
 0x171   : > { %p914_p9 = pnand %p913_p5, %p907_p12 }
 0x173   : > { %917 = shalt.err (!%p914_p9)
}
 0x174   : > { %691 = dma.vmem_to_hbm [thread:$0]  (%p1341_p2), %s1246_s18, 64, %s1244_s29, %s470_s9  }
 0x175 PF: > { %s1342_s20 = sld [smem:[#allocation15_spill]]  ;;  %s510_s27 = sand.u32 1, %s960_s21  }
 0x176   : > { %p1344_p0 = scmp.ge.s32.totalorder %s980_s26, 2  ;;  %s511_s28 = scalar_lea.sflag [#allocation4], %s510_s27 }
 0x17b   : > { %p1343_p11 = scmp.ne.s32.totalorder %s1342_s20, 0 }
 0x17d   : > { %p706_p4 = pnand %p1344_p0, %p1343_p11 }
 0x17f   : > { %951 = dma.done.wait (!%p706_p4), %s511_s28, 64  }
 0x180   : > { %953 = vsyncadd (!%p706_p4), %s511_s28, 4294967232  ;;  %s520_s11 = scalar_lea.sflag [#allocation10], %s510_s27 }
 0x181   : > { %955 = dma.done.wait (!%p706_p4), %s520_s11, 64  }
 0x182   : > { %957 = vsyncadd (!%p706_p4), %s520_s11, 4294967232  ;;  %s27_s26 = sadd.s32 1, %s980_s26   ;;  %s1345_s21 = smov %s964_s22 }
 0x183   : > { %p24_p13 = scmp.ge.s32.totalorder %s27_s26, 4   ;;  %s1346_s22 = smov %s968_s23 }
 0x184   : > { %s1347_s23 = smov %s1168_s13  ;;  %s1348_s24 = smov %s976_s25 }
 0x185   : > { %s1349_s25 = smov %s1351_s16  ;;  %26 = sbr.rel (!%p24_p13) target bundleno = 9 (0x9), region = 110 }
 0x18c   :  { %525 = vsyncpa [#allocation3], 1 }
 0x18d   :  { %527 = vsyncpa [#allocation3 + $0x1], 1 }
 0x18e   :  { %528 = vsyncpa [#allocation6], 1 }
 0x18f   :  { %529 = vsyncpa [#allocation4], 1 }
 0x190   :  { %531 = vsyncpa [#allocation4 + $0x1], 1 }
 0x191   :  { %532 = vsyncpa [#allocation10], 1 }
 0x192   :  { %534 = vsyncpa [#allocation10 + $0x1], 1 }

</bundles_post_ra>
